<compile_context>
chip_gen: v7x
topology: tpu7x:2x2x1
jax: 0.10.0
libtpu: 0.0.40
codegen_flags: <defaults>
</compile_context>

<pallas_src>
import functools

import jax
import jax.numpy as jnp
from jax import lax
from jax.experimental import pallas as pl
from jax.experimental.pallas import tpu as pltpu


# ----------------------------------------------------------------------------
# Pallas kernel: one grid step per block of TP probes; full gallery resident.
#   S[(g,r), (p,s)] = sum_c gal[g, c, r] * prob[p, c, s]
#   slot 0 = max_r S  -> (G, HW_s) slab per probe
#   slot 1 = max_s S  -> (TP, G*HW_r) slab (single store)
# ----------------------------------------------------------------------------
def _qaconv_score_kernel(prob_ref, gal_ref, out0_ref, out1_ref):
    # prob_ref: (TP, HW, C) bf16   (rows indexed by s)
    # gal_ref:  (G*HW, C)  bf16    (rows indexed by (g, r)), resident across the grid
    # out0_ref: (TP, G, HW)  f32   max over r (per s)
    # out1_ref: (TP, 1, G*HW) f32  max over s (per r)
    tp, hw, c = prob_ref.shape
    ghw = gal_ref.shape[0]
    g = ghw // hw

    gal = gal_ref[...]                                   # (G*HW, C)
    prob = prob_ref[...].reshape(tp * hw, c)             # (TP*HW, C) — free regroup (hw % 8 == 0)
    dims = (((1,), (1,)), ((), ()))                      # contract trailing C of both operands

    # Two batched MXU dots, bf16 in / f32 accumulate. K=C is tiny, so the second
    # (swapped-operand) dot is essentially free and avoids any in-kernel transpose.
    s_gr_ps = lax.dot_general(gal, prob, dims,
                              preferred_element_type=jnp.float32)     # (G*HW, TP*HW)
    s_ps_gr = lax.dot_general(prob, gal, dims,
                              preferred_element_type=jnp.float32)     # (TP*HW, G*HW)

    # slot 1: max over s per (g, r) — one sublane reduce, one lane-dense slab store.
    out1_ref[:, 0, :] = jnp.max(s_ps_gr.reshape(tp, hw, ghw), axis=1)  # (TP, G*HW)

    # slot 0: max over r per (g, s) — sublane reduce per gallery image, then one dense
    # (G, HW) slab store per probe via static, 128-aligned lane slices.
    red0 = jnp.max(s_gr_ps.reshape(g, hw, tp * hw), axis=1)            # (G, TP*HW)
    for p in range(tp):                                                 # static, tiny unroll
        out0_ref[p] = red0[:, p * hw:(p + 1) * hw]                      # (G, HW)


def _pick_probe_tile(num_probes):
    if num_probes <= 8:
        return num_probes
    for tp in (8, 4, 2):
        if num_probes % tp == 0:
            return tp
    return 1


def qaconv_pairwise_max(prob_t, gal_flat, *, probes_per_step=None):
    """prob_t: (P, HW, C) bf16, gal_flat: (G*HW, C) bf16 ->
       (max_over_r (P, G, HW) f32, max_over_s (P, 1, G*HW) f32)."""
    P, HW, C = prob_t.shape
    GHW, C2 = gal_flat.shape
    assert C2 == C and GHW % HW == 0
    G = GHW // HW

    TP = probes_per_step if probes_per_step is not None else _pick_probe_tile(P)
    assert P % TP == 0, "probe count must be divisible by the probe tile"
    grid = (P // TP,)

    # VMEM budget check (matters on v7x: 64 MiB physical, 32 MiB default scoped limit).
    score_bytes = 2 * GHW * TP * HW * 4            # both f32 score matrices
    gal_bytes = 2 * GHW * C * 2                    # bf16 gallery (double-buffered by default)
    prob_bytes = 2 * TP * HW * C * 2
    out_bytes = 2 * (TP * G * HW + TP * GHW) * 4
    est = score_bytes + gal_bytes + prob_bytes + out_bytes
    vmem_limit = None if est < (28 << 20) else min(60 << 20, 2 * est)

    cost = pl.CostEstimate(
        flops=4 * P * G * HW * HW * C,             # two MXU dots over all (p, g) pairs
        transcendentals=0,
        bytes_accessed=(prob_t.size + gal_flat.size) * 2 + 2 * P * G * HW * 4,
    )

    return pl.pallas_call(
        _qaconv_score_kernel,
        out_shape=(
            jax.ShapeDtypeStruct((P, G, HW), jnp.float32),     # max over r (per s)
            jax.ShapeDtypeStruct((P, 1, GHW), jnp.float32),    # max over s (per r), (g, r) flat
        ),
        grid_spec=pltpu.PrefetchScalarGridSpec(
            num_scalar_prefetch=0,
            grid=grid,
            in_specs=[
                pl.BlockSpec((TP, HW, C), lambda i: (i, 0, 0)),   # TP probes per step
                pl.BlockSpec((GHW, C), lambda i: (0, 0)),         # resident gallery, fetched once
            ],
            out_specs=[
                pl.BlockSpec((TP, G, HW), lambda i: (i, 0, 0)),
                pl.BlockSpec((TP, 1, GHW), lambda i: (i, 0, 0)),
            ],
        ),
        compiler_params=pltpu.CompilerParams(
            dimension_semantics=("parallel",),     # v7x: probe-block axis splits across 2 TCs
            vmem_limit_bytes=vmem_limit,
        ),
        cost_estimate=cost,
    )(prob_t, gal_flat)


# ----------------------------------------------------------------------------
# Post-kernel head: BatchNorm1d(1) -> Linear(hw, 1) -> pairwise sum -> BatchNorm1d(1)
# (training-mode batch statistics; affine weight=1 / bias=0; fc.weight = 1/hw)
# Kept in plain JAX on purpose: it is O(P*G*HW) scalar glue, not a kernel hot path.
# ----------------------------------------------------------------------------
def _bn_fc_head(max_r, max_s_flat, hw, fc_bias=0.0, eps=1e-5):
    P, G, _ = max_r.shape
    max_s = max_s_flat.reshape(P, G, hw)
    allv = jnp.concatenate([max_r.reshape(-1), max_s.reshape(-1)])
    mean = jnp.mean(allv)
    var = jnp.mean((allv - mean) ** 2)                        # biased variance (PyTorch BN)
    inv = 1.0 / jnp.sqrt(var + eps)                           # self.bn (weight=1, bias=0)
    f0 = jnp.sum((max_r - mean) * inv, axis=-1) / hw + fc_bias    # self.fc (weight = 1/hw)
    f1 = jnp.sum((max_s - mean) * inv, axis=-1) / hw + fc_bias
    score = f0 + f1                                           # view(-1, 2).sum(dim=1)
    m2 = jnp.mean(score)
    v2 = jnp.mean((score - m2) ** 2)
    return (score - m2) / jnp.sqrt(v2 + eps)                  # self.logit_bn -> (P, G)


@functools.partial(jax.jit, static_argnames=("height", "width"))
def qaconv_forward(prob_fea, gal_fea, *, height, width, fc_bias=0.0):
    P, C = prob_fea.shape[0], prob_fea.shape[1]
    G = gal_fea.shape[0]
    hw = height * width
    # bf16 matmul inputs (native MXU dtype, halves HBM->VMEM DMA); f32 accumulation.
    # (N, HW, C) layout so both in-kernel dots contract the trailing C dim; the gallery
    # is pre-flattened to (G*HW, C) so the kernel does batched dots, not per-g loops.
    prob_t = prob_fea.reshape(P, C, hw).astype(jnp.bfloat16).transpose(0, 2, 1)
    gal_flat = (gal_fea.reshape(G, C, hw).astype(jnp.bfloat16)
                .transpose(0, 2, 1).reshape(G * hw, C))
    max_r, max_s_flat = qaconv_pairwise_max(prob_t, gal_flat)   # Pallas hot path
    return _bn_fc_head(max_r, max_s_flat, hw, fc_bias)


# ----------------------------------------------------------------------------
# Pure-JAX reference (mirrors the PyTorch forward line-by-line) for validation.
# matmul_dtype lets us validate against an identically-quantized reference
# (bf16 inputs, f32 accumulation), matching the kernel's MXU path.
# ----------------------------------------------------------------------------
def qaconv_reference(prob_fea, gal_fea, *, height, width, fc_bias=0.0,
                     matmul_dtype=jnp.bfloat16, eps=1e-5):
    P, C = prob_fea.shape[0], prob_fea.shape[1]
    G = gal_fea.shape[0]
    hw = height * width
    prob = prob_fea.reshape(P, C, hw).astype(matmul_dtype)
    gal = gal_fea.reshape(G, C, hw).astype(matmul_dtype)
    score = jnp.einsum("pcs,gcr->pgrs", prob, gal,
                       preferred_element_type=jnp.float32)           # (P, G, hw_r, hw_s)
    score = jnp.concatenate([score.max(axis=2), score.max(axis=3)], axis=-1)  # (P, G, 2*hw)
    x = score.reshape(-1, hw)                                         # view(-1, 1, hw)
    mean = jnp.mean(x)
    var = jnp.mean((x - mean) ** 2)
    x = (x - mean) / jnp.sqrt(var + eps)                              # self.bn
    s = jnp.sum(x, axis=1, keepdims=True) / hw + fc_bias              # self.fc (weight = 1/hw)
    s = s.reshape(-1, 2).sum(axis=1, keepdims=True)
    m2 = jnp.mean(s)
    v2 = jnp.mean((s - m2) ** 2)
    s = (s - m2) / jnp.sqrt(v2 + eps)                                 # self.logit_bn
    return s.reshape(P, G)


if __name__ == "__main__":
    # Module config: num_features=16, height=8, width=16  -> hw = 128 (lane aligned)
    num_features, height, width = 16, 8, 16
    P, G = 2, 3

    key = jax.random.PRNGKey(0)
    kp, kg = jax.random.split(key)
    prob_fea = jax.random.normal(kp, (P, num_features, height, width), jnp.float32)
    gal_fea = jax.random.normal(kg, (G, num_features, height, width), jnp.float32)

    # fc.weight = 1/hw (reset_parameters); fc.bias is a random constant in PyTorch and
    # cancels exactly under the final logit_bn mean subtraction -> use 0.0.
    fc_bias = 0.0

    out = qaconv_forward(prob_fea, gal_fea, height=height, width=width, fc_bias=fc_bias)
    out = jax.block_until_ready(out)

    # Validate against the line-by-line reference using the same bf16 matmul inputs
    # (the kernel's deliberate MXU-native quantization choice); head runs in f32.
    ref = qaconv_reference(prob_fea, gal_fea, height=height, width=width,
                           fc_bias=fc_bias, matmul_dtype=jnp.bfloat16)
    assert out.shape == (P, G)
    assert jnp.allclose(out, ref, atol=1e-3, rtol=1e-3), (out, ref)

    print("KERNEL_OK")
</pallas_src>

<mosaic_0001>
module attributes {stable_mosaic.version = 11 : i64} {
  func.func @_qaconv_score_kernel(%arg0: i32, %arg1: memref<2x128x16xbf16, #tpu.memory_space<vmem>>, %arg2: memref<384x16xbf16, #tpu.memory_space<vmem>>, %arg3: memref<2x3x128xf32, #tpu.memory_space<vmem>>, %arg4: memref<2x1x384xf32, #tpu.memory_space<vmem>>) attributes {dimension_semantics = [#tpu.dimension_semantics<parallel>], iteration_bounds = array<i64: 1>, scalar_prefetch = 0 : i64, scratch_operands = 0 : i64, tpu.core_type = #tpu.core_type<tc>, window_params = [{transform_indices = @transform_0, window_bounds = array<i64: 2, 128, 16>}, {pipeline_mode = #tpu.pipeline_mode<synchronous>, transform_indices = @transform_1, window_bounds = array<i64: 384, 16>}, {transform_indices = @transform_2, window_bounds = array<i64: 2, 3, 128>}, {transform_indices = @transform_3, window_bounds = array<i64: 2, 1, 384>}]} {
    %c0 = arith.constant 0 : index
    %c0_0 = arith.constant 0 : index
    %0 = vector.load %arg2[%c0, %c0_0] : memref<384x16xbf16, #tpu.memory_space<vmem>>, vector<384x16xbf16>
    %c0_1 = arith.constant 0 : index
    %c0_2 = arith.constant 0 : index
    %c0_3 = arith.constant 0 : index
    %1 = vector.load %arg1[%c0_1, %c0_2, %c0_3] : memref<2x128x16xbf16, #tpu.memory_space<vmem>>, vector<2x128x16xbf16>
    %2 = vector.shape_cast %1 : vector<2x128x16xbf16> to vector<256x16xbf16>
    %cst = arith.constant dense<0.000000e+00> : vector<384x256xf32>
    %3 = tpu.matmul %0, %2, %cst {dimension_numbers = #tpu.dot_dimension_numbers<[1], [1], [0], [0], [0, 0, 1, 0], [], []>} : vector<384x16xbf16>, vector<256x16xbf16>, vector<384x256xf32> -> vector<384x256xf32>
    %cst_4 = arith.constant dense<0.000000e+00> : vector<256x384xf32>
    %4 = tpu.matmul %2, %0, %cst_4 {dimension_numbers = #tpu.dot_dimension_numbers<[1], [1], [0], [0], [0, 0, 1, 0], [], []>} : vector<256x16xbf16>, vector<384x16xbf16>, vector<256x384xf32> -> vector<256x384xf32>
    %5 = vector.shape_cast %4 : vector<256x384xf32> to vector<2x128x384xf32>
    %cst_5 = arith.constant dense<0xFF800000> : vector<2x384xf32>
    %6 = vector.multi_reduction <maximumf>, %5, %cst_5 [1] : vector<2x128x384xf32> to vector<2x384xf32>
    %c0_6 = arith.constant 0 : index
    %c0_7 = arith.constant 0 : index
    %c0_8 = arith.constant 0 : index
    %7 = vector.load %arg4[%c0_6, %c0_7, %c0_8] : memref<2x1x384xf32, #tpu.memory_space<vmem>>, vector<2x1x384xf32>
    %8 = vector.shape_cast %7 : vector<2x1x384xf32> to vector<2x384xf32>
    %9 = vector.shape_cast %6 : vector<2x384xf32> to vector<2x1x384xf32>
    tpu.vector_store %arg4[%c0_6, %c0_7, %c0_8], %9 {strides = array<i32>} : memref<2x1x384xf32, #tpu.memory_space<vmem>>, vector<2x1x384xf32>,
    %10 = vector.shape_cast %3 : vector<384x256xf32> to vector<3x128x256xf32>
    %cst_9 = arith.constant dense<0xFF800000> : vector<3x256xf32>
    %11 = vector.multi_reduction <maximumf>, %10, %cst_9 [1] : vector<3x128x256xf32> to vector<3x256xf32>
    %12 = vector.extract_strided_slice %11 {offsets = [0, 0], sizes = [3, 128], strides = [1, 1]} : vector<3x256xf32> to vector<3x128xf32>
    %c0_10 = arith.constant 0 : index
    %c0_11 = arith.constant 0 : index
    %c0_12 = arith.constant 0 : index
    %13 = vector.load %arg3[%c0_10, %c0_11, %c0_12] : memref<2x3x128xf32, #tpu.memory_space<vmem>>, vector<1x3x128xf32>
    %14 = vector.shape_cast %13 : vector<1x3x128xf32> to vector<3x128xf32>
    %15 = vector.shape_cast %12 : vector<3x128xf32> to vector<1x3x128xf32>
    tpu.vector_store %arg3[%c0_10, %c0_11, %c0_12], %15 {strides = array<i32>} : memref<2x3x128xf32, #tpu.memory_space<vmem>>, vector<1x3x128xf32>,
    %16 = vector.extract_strided_slice %11 {offsets = [0, 128], sizes = [3, 128], strides = [1, 1]} : vector<3x256xf32> to vector<3x128xf32>
    %c1 = arith.constant 1 : index
    %c0_13 = arith.constant 0 : index
    %c0_14 = arith.constant 0 : index
    %17 = vector.load %arg3[%c1, %c0_13, %c0_14] : memref<2x3x128xf32, #tpu.memory_space<vmem>>, vector<1x3x128xf32>
    %18 = vector.shape_cast %17 : vector<1x3x128xf32> to vector<3x128xf32>
    %19 = vector.shape_cast %16 : vector<3x128xf32> to vector<1x3x128xf32>
    tpu.vector_store %arg3[%c1, %c0_13, %c0_14], %19 {strides = array<i32>} : memref<2x3x128xf32, #tpu.memory_space<vmem>>, vector<1x3x128xf32>,
    return
  }
  func.func @transform_0(%arg0: i32) -> (i32, i32, i32) {
    %c0_i32 = arith.constant 0 : i32
    %c0_i32_0 = arith.constant 0 : i32
    %c0_i32_1 = arith.constant 0 : i32
    return %arg0, %c0_i32, %c0_i32_0 : i32, i32, i32
  }
  func.func @transform_1(%arg0: i32) -> (i32, i32) {
    %c0_i32 = arith.constant 0 : i32
    %c0_i32_0 = arith.constant 0 : i32
    %c0_i32_1 = arith.constant 0 : i32
    return %c0_i32, %c0_i32_0 : i32, i32
  }
  func.func @transform_2(%arg0: i32) -> (i32, i32, i32) {
    %c0_i32 = arith.constant 0 : i32
    %c0_i32_0 = arith.constant 0 : i32
    %c0_i32_1 = arith.constant 0 : i32
    return %arg0, %c0_i32, %c0_i32_0 : i32, i32, i32
  }
  func.func @transform_3(%arg0: i32) -> (i32, i32, i32) {
    %c0_i32 = arith.constant 0 : i32
    %c0_i32_0 = arith.constant 0 : i32
    %c0_i32_1 = arith.constant 0 : i32
    return %arg0, %c0_i32, %c0_i32_0 : i32, i32, i32
  }
}

</mosaic_0001>

<bundles_post_ra>
// kernel: qaconv_forward.1
= control target key start
LH: loop header
LB: loop body
LE: loop exit
PB: predicated region body
PF: predicated region fallthrough
CT: control target
= control target key end

     0   :  { %vm294_vm0 = vcmask 130048   ;;  %vm1357_vm1 = vcmask 1041409   ;;  %vm1359_vm3 = vcmask 1042434   ;;  %s2296_s0 = inlined_call_operand.vmem [shape: bf16[2,128,16], index: 0, kind: input, shape index: {}]   ;;  %s2297_s1 = inlined_call_operand.vmem [shape: bf16[384,16], index: 1, kind: input, shape index: {}]   ;;  %s2298_s3 = inlined_call_operand.vmem [shape: f32[2,1,384], index: 3, kind: output, shape index: {1}]   ;;  %s2299_s2 = inlined_call_operand.vmem [shape: f32[2,3,128], index: 2, kind: output, shape index: {0}]  }
   0x1   :  { %v1749_v0 = vld [vmem:[%s2296_s0 + $0x40] sm:$0xff]   ;;  %v1775_v5 = vld [vmem:[%s2296_s0 + $0x48] sm:$0xff]   ;;  %v1807_v11 = vld [vmem:[%s2296_s0 + $0x50] sm:$0xff]  }
   0x2   :  { %v1754_v1 = vld [vmem:[%s2297_s1 + $0x40] sm:$0xff]   ;;  %1660 = vmatprep.subr.msk.bf16.mxu0 %vm294_vm0, %v1749_v0  ;;  %v1784_v7 = vld [vmem:[%s2297_s1 + $0x48] sm:$0xff]   ;;  %v1814_v13 = vld [vmem:[%s2297_s1 + $0x50] sm:$0xff]  }
   0x3   :  { %v1761_v2 = vld [vmem:[%s2296_s0] sm:$0xff]   ;;  %1668 = vmatprep.subr.msk.bf16.mxu1 %vm294_vm0, %v1754_v1  ;;  %v1793_v8 = vld [vmem:[%s2296_s0 + $0x8] sm:$0xff]   ;;  %v1821_v14 = vld [vmem:[%s2296_s0 + $0x10] sm:$0xff]  }
   0x4   :  { %v1768_v3 = vld [vmem:[%s2297_s1] sm:$0xff]   ;;  %v368_v4 = vsel %vm294_vm0, %v1761_v2, 0  ;;  %1556 = vmatprep.mubr.msk.bf16.mxu1 %vm294_vm0, %v1761_v2  ;;  %v1800_v9 = vld [vmem:[%s2297_s1 + $0x8] sm:$0xff]   ;;  %v371_v10 = vsel %vm294_vm0, %v1793_v8, 0  ;;  %v1828_v15 = vld [vmem:[%s2297_s1 + $0x10] sm:$0xff]   ;;  %v374_v16 = vsel %vm294_vm0, %v1821_v14, 0 }
   0x5   :  { %1477 = vmatpush3.bf16.xpose.msra.mxu0 %v368_v4  ;;  %v296_v6 = vsel %vm294_vm0, %v1768_v3, 0  ;;  %1492 = vmatprep.mubr.msk.bf16.mxu0 %vm294_vm0, %v1768_v3  ;;  %v299_v12 = vsel %vm294_vm0, %v1800_v9, 0  ;;  %v1835_v17 = vld [vmem:[%s2296_s0 + $0x58] sm:$0xff]   ;;  %v302_v18 = vsel %vm294_vm0, %v1828_v15, 0  ;;  %v1863_v23 = vld [vmem:[%s2296_s0 + $0x60] sm:$0xff]   ;;  %v1891_v29 = vld [vmem:[%s2296_s0 + $0x68] sm:$0xff]  }
   0x6   :  { %1541 = vmatpush3.bf16.xpose.msra.mxu1 %v296_v6  ;;  %1661 = vmatprep.subr.msk.bf16.mxu0 %vm294_vm0, %v1775_v5  ;;  %v1842_v19 = vld [vmem:[%s2297_s1 + $0x58] sm:$0xff]   ;;  %v1870_v25 = vld [vmem:[%s2297_s1 + $0x60] sm:$0xff]   ;;  %v1898_v31 = vld [vmem:[%s2297_s1 + $0x68] sm:$0xff]  }
   0x7   :  { %1669 = vmatprep.subr.msk.bf16.mxu1 %vm294_vm0, %v1784_v7  ;;  %v1849_v20 = vld [vmem:[%s2296_s0 + $0x18] sm:$0xff]   ;;  %v1877_v26 = vld [vmem:[%s2296_s0 + $0x20] sm:$0xff]   ;;  %v1905_v32 = vld [vmem:[%s2296_s0 + $0x28] sm:$0xff]  }
   0x8   :  { %v1856_v21 = vld [vmem:[%s2297_s1 + $0x18] sm:$0xff]   ;;  %v377_v22 = vsel %vm294_vm0, %v1849_v20, 0  ;;  %v1884_v27 = vld [vmem:[%s2297_s1 + $0x20] sm:$0xff]   ;;  %v380_v28 = vsel %vm294_vm0, %v1877_v26, 0  ;;  %v1912_v33 = vld [vmem:[%s2297_s1 + $0x28] sm:$0xff]   ;;  %v383_v34 = vsel %vm294_vm0, %v1905_v32, 0 }
   0x9   :  { %v305_v24 = vsel %vm294_vm0, %v1856_v21, 0  ;;  %v308_v30 = vsel %vm294_vm0, %v1884_v27, 0  ;;  %v1919_v35 = vld [vmem:[%s2296_s0 + $0x70] sm:$0xff]   ;;  %v311_v36 = vsel %vm294_vm0, %v1912_v33, 0  ;;  %v1947_v41 = vld [vmem:[%s2296_s0 + $0x78] sm:$0xff]   ;;  %v1977_v48 = vld [vmem:[%s2297_s1 + $0x80] sm:$0xff]  }
   0xa   :  { %v1926_v37 = vld [vmem:[%s2297_s1 + $0x70] sm:$0xff]   ;;  %v1954_v43 = vld [vmem:[%s2297_s1 + $0x78] sm:$0xff]   ;;  %v344_v49 = vsel %vm294_vm0, %v1977_v48, 0  ;;  %v1986_v50 = vld [vmem:[%s2297_s1 + $0x88] sm:$0xff]  }
   0xb   :  { %v1933_v38 = vld [vmem:[%s2296_s0 + $0x30] sm:$0xff]   ;;  %v1961_v44 = vld [vmem:[%s2296_s0 + $0x38] sm:$0xff]   ;;  %v347_v51 = vsel %vm294_vm0, %v1986_v50, 0  ;;  %v2037_v56 = vld [vmem:[%s2297_s1 + $0xa0] sm:$0xff]  }
   0xc   :  { %v1940_v39 = vld [vmem:[%s2297_s1 + $0x30] sm:$0xff]   ;;  %v386_v40 = vsel %vm294_vm0, %v1933_v38, 0  ;;  %v1968_v45 = vld [vmem:[%s2297_s1 + $0x38] sm:$0xff]   ;;  %v389_v46 = vsel %vm294_vm0, %v1961_v44, 0  ;;  %v356_v57 = vsel %vm294_vm0, %v2037_v56, 0  ;;  %v2054_v58 = vld [vmem:[%s2297_s1 + $0xa8] sm:$0xff]  }
   0xd   :  { %1479 = vmatpush3.bf16.xpose.msra.mxu0 %v371_v10  ;;  %v314_v42 = vsel %vm294_vm0, %v1940_v39, 0  ;;  %v317_v47 = vsel %vm294_vm0, %v1968_v45, 0  ;;  %v2003_v52 = vld [vmem:[%s2297_s1 + $0x90] sm:$0xff]   ;;  %v2020_v54 = vld [vmem:[%s2297_s1 + $0x98] sm:$0xff]   ;;  %v359_v59 = vsel %vm294_vm0, %v2054_v58, 0 }
   0xe   :  { %1543 = vmatpush3.bf16.xpose.msra.mxu1 %v299_v12  ;;  %1662 = vmatprep.subr.msk.bf16.mxu0 %vm294_vm0, %v1807_v11  ;;  %v350_v53 = vsel %vm294_vm0, %v2003_v52, 0  ;;  %v353_v55 = vsel %vm294_vm0, %v2020_v54, 0  ;;  %v2071_v60 = vld [vmem:[%s2297_s1 + $0xb0] sm:$0xff]   ;;  %v2088_v62 = vld [vmem:[%s2297_s1 + $0xb8] sm:$0xff]  }
   0xf   :  { %1670 = vmatprep.subr.msk.bf16.mxu1 %vm294_vm0, %v1814_v13  ;;  %v362_v61 = vsel %vm294_vm0, %v2071_v60, 0  ;;  %v365_v63 = vsel %vm294_vm0, %v2088_v62, 0 }
  0x15   :  { %1481 = vmatpush3.bf16.xpose.msra.mxu0 %v374_v16 }
  0x16   :  { %1545 = vmatpush3.bf16.xpose.msra.mxu1 %v302_v18  ;;  %1663 = vmatprep.subr.msk.bf16.mxu0 %vm294_vm0, %v1835_v17 }
  0x17   :  { %1671 = vmatprep.subr.msk.bf16.mxu1 %vm294_vm0, %v1842_v19 }
  0x1d   :  { %1483 = vmatpush3.bf16.xpose.msra.mxu0 %v377_v22 }
  0x1e   :  { %1547 = vmatpush3.bf16.xpose.msra.mxu1 %v305_v24  ;;  %1664 = vmatprep.subr.msk.bf16.mxu0 %vm294_vm0, %v1863_v23 }
  0x1f   :  { %1672 = vmatprep.subr.msk.bf16.mxu1 %vm294_vm0, %v1870_v25 }
  0x25   :  { %1485 = vmatpush3.bf16.xpose.msra.mxu0 %v380_v28 }
  0x26   :  { %1549 = vmatpush3.bf16.xpose.msra.mxu1 %v308_v30  ;;  %1665 = vmatprep.subr.msk.bf16.mxu0 %vm294_vm0, %v1891_v29 }
  0x27   :  { %1673 = vmatprep.subr.msk.bf16.mxu1 %vm294_vm0, %v1898_v31 }
  0x2d   :  { %1487 = vmatpush3.bf16.xpose.msra.mxu0 %v383_v34 }
  0x2e   :  { %1551 = vmatpush3.bf16.xpose.msra.mxu1 %v311_v36  ;;  %1666 = vmatprep.subr.msk.bf16.mxu0 %vm294_vm0, %v1919_v35 }
  0x2f   :  { %1674 = vmatprep.subr.msk.bf16.mxu1 %vm294_vm0, %v1926_v37 }
  0x35   :  { %1489 = vmatpush3.bf16.xpose.msra.mxu0 %v386_v40 }
  0x36   :  { %1553 = vmatpush3.bf16.xpose.msra.mxu1 %v314_v42  ;;  %1667 = vmatprep.subr.msk.bf16.mxu0 %vm294_vm0, %v1947_v41 }
  0x37   :  { %1675 = vmatprep.subr.msk.bf16.mxu1 %vm294_vm0, %v1954_v43 }
  0x3d   :  { %1491 = vmatpush3.bf16.xpose.msra.mxu0 %v389_v46 }
  0x3e   :  { %1555 = vmatpush3.bf16.xpose.msra.mxu1 %v317_v47 }
  0x3f   :  { %1676 = vmatprep.subr.msk.bf16.mxu1 %vm294_vm0, %v1977_v48 }
  0x44   :  { %1493 = vmatmul.mubr.msk.bf16.vlgmr.msra.gmra.mrb[0].mxu0 %vm294_vm0, %v1768_v3 }
  0x45   :  { %1557 = vmatmul.mubr.msk.bf16.vlgmr.msra.gmra.mrb[0].mxu1 %vm294_vm0, %v1761_v2  ;;  %1494 = vmatprep.mubr.msk.bf16.mxu0 %vm294_vm0, %v1800_v9 }
  0x46   :  { %1613 = vmatpush3.bf16.xpose.msra.mxu1 %v344_v49  ;;  %1558 = vmatprep.mubr.msk.bf16.mxu1 %vm294_vm0, %v1793_v8 }
  0x47   :  { %1677 = vmatprep.subr.msk.bf16.mxu1 %vm294_vm0, %v1986_v50 }
  0x4c   :  { %1495 = vmatmul.mubr.msk.bf16.gmra.mrb[4].mxu0 %vm294_vm0, %v1800_v9 }
  0x4d   :  { %1559 = vmatmul.mubr.msk.bf16.gmra.mrb[4].mxu1 %vm294_vm0, %v1793_v8  ;;  %1496 = vmatprep.mubr.msk.bf16.mxu0 %vm294_vm0, %v1828_v15 }
  0x4e   :  { %1560 = vmatprep.mubr.msk.bf16.mxu1 %vm294_vm0, %v1821_v14  ;;  %1615 = vmatpush3.bf16.xpose.msra.mxu1 %v347_v51 }
  0x4f   :  { %1678 = vmatprep.subr.msk.bf16.mxu1 %vm294_vm0, %v2003_v52 }
  0x54   :  { %1497 = vmatmul.mubr.msk.bf16.gmra.mrb[8].mxu0 %vm294_vm0, %v1828_v15 }
  0x55   :  { %1561 = vmatmul.mubr.msk.bf16.gmra.mrb[8].mxu1 %vm294_vm0, %v1821_v14  ;;  %1498 = vmatprep.mubr.msk.bf16.mxu0 %vm294_vm0, %v1856_v21 }
  0x56   :  { %1562 = vmatprep.mubr.msk.bf16.mxu1 %vm294_vm0, %v1849_v20  ;;  %1617 = vmatpush3.bf16.xpose.msra.mxu1 %v350_v53 }
  0x57   :  { %1679 = vmatprep.subr.msk.bf16.mxu1 %vm294_vm0, %v2020_v54 }
  0x5c   :  { %1499 = vmatmul.mubr.msk.bf16.gmra.mrb[12].mxu0 %vm294_vm0, %v1856_v21 }
  0x5d   :  { %1563 = vmatmul.mubr.msk.bf16.gmra.mrb[12].mxu1 %vm294_vm0, %v1849_v20  ;;  %1500 = vmatprep.mubr.msk.bf16.mxu0 %vm294_vm0, %v1884_v27 }
  0x5e   :  { %1564 = vmatprep.mubr.msk.bf16.mxu1 %vm294_vm0, %v1877_v26  ;;  %1619 = vmatpush3.bf16.xpose.msra.mxu1 %v353_v55 }
  0x5f   :  { %1680 = vmatprep.subr.msk.bf16.mxu1 %vm294_vm0, %v2037_v56 }
  0x64   :  { %1501 = vmatmul.mubr.msk.bf16.gmra.mrb[16].mxu0 %vm294_vm0, %v1884_v27 }
  0x65   :  { %1565 = vmatmul.mubr.msk.bf16.gmra.mrb[16].mxu1 %vm294_vm0, %v1877_v26  ;;  %1502 = vmatprep.mubr.msk.bf16.mxu0 %vm294_vm0, %v1912_v33 }
  0x66   :  { %1566 = vmatprep.mubr.msk.bf16.mxu1 %vm294_vm0, %v1905_v32  ;;  %1621 = vmatpush3.bf16.xpose.msra.mxu1 %v356_v57 }
  0x67   :  { %1681 = vmatprep.subr.msk.bf16.mxu1 %vm294_vm0, %v2054_v58 }
  0x6c   :  { %1503 = vmatmul.mubr.msk.bf16.gmra.mrb[20].mxu0 %vm294_vm0, %v1912_v33 }
  0x6d   :  { %1567 = vmatmul.mubr.msk.bf16.gmra.mrb[20].mxu1 %vm294_vm0, %v1905_v32  ;;  %1504 = vmatprep.mubr.msk.bf16.mxu0 %vm294_vm0, %v1940_v39 }
  0x6e   :  { %1568 = vmatprep.mubr.msk.bf16.mxu1 %vm294_vm0, %v1933_v38  ;;  %1623 = vmatpush3.bf16.xpose.msra.mxu1 %v359_v59 }
  0x6f   :  { %1682 = vmatprep.subr.msk.bf16.mxu1 %vm294_vm0, %v2071_v60 }
  0x74   :  { %1505 = vmatmul.mubr.msk.bf16.gmra.mrb[24].mxu0 %vm294_vm0, %v1940_v39 }
  0x75   :  { %1569 = vmatmul.mubr.msk.bf16.gmra.mrb[24].mxu1 %vm294_vm0, %v1933_v38  ;;  %1506 = vmatprep.mubr.msk.bf16.mxu0 %vm294_vm0, %v1968_v45 }
  0x76   :  { %1570 = vmatprep.mubr.msk.bf16.mxu1 %vm294_vm0, %v1961_v44  ;;  %1625 = vmatpush3.bf16.xpose.msra.mxu1 %v362_v61 }
  0x77   :  { %1683 = vmatprep.subr.msk.bf16.mxu1 %vm294_vm0, %v2088_v62 }
  0x7c   :  { %1507 = vmatmul.mubr.msk.bf16.gmra.mrb[28].mxu0 %vm294_vm0, %v1968_v45 }
  0x7d   :  { %1571 = vmatmul.mubr.msk.bf16.gmra.mrb[28].mxu1 %vm294_vm0, %v1961_v44  ;;  %1508 = vmatprep.mubr.msk.bf16.mxu0 %vm294_vm0, %v1754_v1 }
  0x7e   :  { %1572 = vmatprep.mubr.msk.bf16.mxu1 %vm294_vm0, %v1749_v0  ;;  %1627 = vmatpush3.bf16.xpose.msra.mxu1 %v365_v63 }
  0x84   :  { %1509 = vmatmul.mubr.msk.bf16.gmra.mrb[32].mxu0 %vm294_vm0, %v1754_v1 }
  0x85   :  { %1573 = vmatmul.mubr.msk.bf16.gmra.mrb[32].mxu1 %vm294_vm0, %v1749_v0  ;;  %1510 = vmatprep.mubr.msk.bf16.mxu0 %vm294_vm0, %v1784_v7 }
  0x86   :  { %1574 = vmatprep.mubr.msk.bf16.mxu1 %vm294_vm0, %v1775_v5 }
  0x8c   :  { %1511 = vmatmul.mubr.msk.bf16.gmra.mrb[36].mxu0 %vm294_vm0, %v1784_v7 }
  0x8d   :  { %1575 = vmatmul.mubr.msk.bf16.gmra.mrb[36].mxu1 %vm294_vm0, %v1775_v5  ;;  %1512 = vmatprep.mubr.msk.bf16.mxu0 %vm294_vm0, %v1814_v13 }
  0x8e   :  { %1576 = vmatprep.mubr.msk.bf16.mxu1 %vm294_vm0, %v1807_v11 }
  0x94   :  { %1513 = vmatmul.mubr.msk.bf16.gmra.mrb[40].mxu0 %vm294_vm0, %v1814_v13 }
  0x95   :  { %1577 = vmatmul.mubr.msk.bf16.gmra.mrb[40].mxu1 %vm294_vm0, %v1807_v11  ;;  %1514 = vmatprep.mubr.msk.bf16.mxu0 %vm294_vm0, %v1842_v19 }
  0x96   :  { %1578 = vmatprep.mubr.msk.bf16.mxu1 %vm294_vm0, %v1835_v17 }
  0x9c   :  { %1515 = vmatmul.mubr.msk.bf16.gmra.mrb[44].mxu0 %vm294_vm0, %v1842_v19 }
  0x9d   :  { %1579 = vmatmul.mubr.msk.bf16.gmra.mrb[44].mxu1 %vm294_vm0, %v1835_v17  ;;  %1516 = vmatprep.mubr.msk.bf16.mxu0 %vm294_vm0, %v1870_v25 }
  0x9e   :  { %1580 = vmatprep.mubr.msk.bf16.mxu1 %vm294_vm0, %v1863_v23 }
  0xa4   :  { %1517 = vmatmul.mubr.msk.bf16.gmra.mrb[48].mxu0 %vm294_vm0, %v1870_v25 }
  0xa5   :  { %1581 = vmatmul.mubr.msk.bf16.gmra.mrb[48].mxu1 %vm294_vm0, %v1863_v23  ;;  %1518 = vmatprep.mubr.msk.bf16.mxu0 %vm294_vm0, %v1898_v31 }
  0xa6   :  { %1582 = vmatprep.mubr.msk.bf16.mxu1 %vm294_vm0, %v1891_v29 }
  0xac   :  { %1519 = vmatmul.mubr.msk.bf16.gmra.mrb[52].mxu0 %vm294_vm0, %v1898_v31 }
  0xad   :  { %1583 = vmatmul.mubr.msk.bf16.gmra.mrb[52].mxu1 %vm294_vm0, %v1891_v29  ;;  %1520 = vmatprep.mubr.msk.bf16.mxu0 %vm294_vm0, %v1926_v37 }
  0xae   :  { %1584 = vmatprep.mubr.msk.bf16.mxu1 %vm294_vm0, %v1919_v35 }
  0xb4   :  { %1521 = vmatmul.mubr.msk.bf16.gmra.mrb[56].mxu0 %vm294_vm0, %v1926_v37 }
  0xb5   :  { %1585 = vmatmul.mubr.msk.bf16.gmra.mrb[56].mxu1 %vm294_vm0, %v1919_v35  ;;  %1522 = vmatprep.mubr.msk.bf16.mxu0 %vm294_vm0, %v1954_v43 }
  0xb6   :  { %1586 = vmatprep.mubr.msk.bf16.mxu1 %vm294_vm0, %v1947_v41 }
  0xbc   :  { %1523 = vmatmul.mubr.msk.bf16.gmra.mrb[60].mxu0 %vm294_vm0, %v1954_v43 }
  0xbd   :  { %1587 = vmatmul.mubr.msk.bf16.gmra.mrb[60].mxu1 %vm294_vm0, %v1947_v41  ;;  %1524 = vmatprep.mubr.msk.bf16.mxu0 %vm294_vm0, %v1977_v48 }
  0xbe   :  { %1628 = vmatprep.mubr.msk.bf16.mxu1 %vm294_vm0, %v1761_v2 }
  0xc4   :  { %1525 = vmatmul.mubr.msk.bf16.gmra.mrb[64].mxu0 %vm294_vm0, %v1977_v48 }
  0xc5   :  { %1629 = vmatmul.mubr.msk.bf16.vlgmr.msra.gmra.mrb[64].mxu1 %vm294_vm0, %v1793_v8  ;;  %1526 = vmatprep.mubr.msk.bf16.mxu0 %vm294_vm0, %v1986_v50 }
  0xc6   :  { %1632 = vmatprep.mubr.msk.bf16.mxu1 %vm294_vm0, %v1821_v14 }
  0xcc   :  { %1527 = vmatmul.mubr.msk.bf16.gmra.mrb[68].mxu0 %vm294_vm0, %v1986_v50 }
  0xcd   :  { %1633 = vmatmul.mubr.msk.bf16.gmra.mrb[68].mxu1 %vm294_vm0, %v1849_v20  ;;  %1528 = vmatprep.mubr.msk.bf16.mxu0 %vm294_vm0, %v2003_v52 }
  0xce   :  { %1636 = vmatprep.mubr.msk.bf16.mxu1 %vm294_vm0, %v1877_v26 }
  0xd4   :  { %1529 = vmatmul.mubr.msk.bf16.gmra.mrb[72].mxu0 %vm294_vm0, %v2003_v52 }
  0xd5   :  { %1637 = vmatmul.mubr.msk.bf16.gmra.mrb[72].mxu1 %vm294_vm0, %v1905_v32  ;;  %1530 = vmatprep.mubr.msk.bf16.mxu0 %vm294_vm0, %v2020_v54 }
  0xd6   :  { %1640 = vmatprep.mubr.msk.bf16.mxu1 %vm294_vm0, %v1933_v38 }
  0xdc   :  { %1531 = vmatmul.mubr.msk.bf16.gmra.mrb[76].mxu0 %vm294_vm0, %v2020_v54 }
  0xdd   :  { %1641 = vmatmul.mubr.msk.bf16.gmra.mrb[76].mxu1 %vm294_vm0, %v1961_v44  ;;  %1532 = vmatprep.mubr.msk.bf16.mxu0 %vm294_vm0, %v2037_v56 }
  0xde   :  { %1644 = vmatprep.mubr.msk.bf16.mxu1 %vm294_vm0, %v1749_v0 }
  0xe4   :  { %1533 = vmatmul.mubr.msk.bf16.gmra.mrb[80].mxu0 %vm294_vm0, %v2037_v56 }
  0xe5   :  { %1645 = vmatmul.mubr.msk.bf16.gmra.mrb[80].mxu1 %vm294_vm0, %v1775_v5  ;;  %1534 = vmatprep.mubr.msk.bf16.mxu0 %vm294_vm0, %v2054_v58 }
  0xe6   :  { %1648 = vmatprep.mubr.msk.bf16.mxu1 %vm294_vm0, %v1807_v11 }
  0xec   :  { %1535 = vmatmul.mubr.msk.bf16.gmra.mrb[84].mxu0 %vm294_vm0, %v2054_v58 }
  0xed   :  { %1649 = vmatmul.mubr.msk.bf16.gmra.mrb[84].mxu1 %vm294_vm0, %v1835_v17  ;;  %1536 = vmatprep.mubr.msk.bf16.mxu0 %vm294_vm0, %v2071_v60 }
  0xee   :  { %1652 = vmatprep.mubr.msk.bf16.mxu1 %vm294_vm0, %v1863_v23 }
  0xf4   :  { %1537 = vmatmul.mubr.msk.bf16.gmra.mrb[88].mxu0 %vm294_vm0, %v2071_v60 }
  0xf5   :  { %1653 = vmatmul.mubr.msk.bf16.gmra.mrb[88].mxu1 %vm294_vm0, %v1891_v29  ;;  %1538 = vmatprep.mubr.msk.bf16.mxu0 %vm294_vm0, %v2088_v62 }
  0xf6   :  { %1656 = vmatprep.mubr.msk.bf16.mxu1 %vm294_vm0, %v1919_v35 }
  0xfc   :  { %1539 = vmatmul.mubr.msk.bf16.gmra.mrb[92].mxu0 %vm294_vm0, %v2088_v62 }
  0xfd   :  { %1657 = vmatmul.mubr.msk.bf16.gmra.mrb[92].mxu1 %vm294_vm0, %v1947_v41 }
 0x117   :  { %v449_v0 = vpop.f32.mrb[0].mxu0 }
 0x118   :  { %v722_v1 = vpop.f32.mrb[0].mxu1  ;;  %v451_v2 = vpop.f32.mrb[1].mxu0 }
 0x119   :  { %v724_v3 = vpop.f32.mrb[1].mxu1  ;;  %v453_v4 = vpop.f32.mrb[2].mxu0 }
 0x11a   :  { %v726_v5 = vpop.f32.mrb[2].mxu1  ;;  %v1228_v6 = vmax.f32 %v449_v0, %v453_v4  ;;  %v455_v7 = vpop.f32.mrb[3].mxu0 }
 0x11b   :  { %v1042_v8 = vmax.f32 %v722_v1, %v726_v5  ;;  %v728_v9 = vpop.f32.mrb[3].mxu1  ;;  %v1249_v10 = vmax.f32 %v451_v2, %v455_v7 }
 0x11c   :  { %v1063_v11 = vmax.f32 %v724_v3, %v728_v9 }
 0x11f   :  { %v459_v12 = vpop.f32.mrb[4].mxu0 }
 0x120   :  { %v732_v13 = vpop.f32.mrb[4].mxu1  ;;  %v1229_v14 = vmax.f32 %v1228_v6, %v459_v12  ;;  %v461_v15 = vpop.f32.mrb[5].mxu0 }
 0x121   :  { %v1043_v16 = vmax.f32 %v1042_v8, %v732_v13  ;;  %v734_v17 = vpop.f32.mrb[5].mxu1  ;;  %v1250_v18 = vmax.f32 %v1249_v10, %v461_v15  ;;  %v463_v19 = vpop.f32.mrb[6].mxu0 }
 0x122   :  { %v1064_v20 = vmax.f32 %v1063_v11, %v734_v17  ;;  %v736_v21 = vpop.f32.mrb[6].mxu1  ;;  %v1230_v22 = vmax.f32 %v1229_v14, %v463_v19  ;;  %v465_v23 = vpop.f32.mrb[7].mxu0 }
 0x123   :  { %v1044_v24 = vmax.f32 %v1043_v16, %v736_v21  ;;  %v738_v25 = vpop.f32.mrb[7].mxu1  ;;  %v1251_v26 = vmax.f32 %v1250_v18, %v465_v23 }
 0x124   :  { %v1065_v27 = vmax.f32 %v1064_v20, %v738_v25 }
 0x127   :  { %v469_v28 = vpop.f32.mrb[8].mxu0 }
 0x128   :  { %v1231_v29 = vmax.f32 %v1230_v22, %v469_v28  ;;  %v742_v30 = vpop.f32.mrb[8].mxu1  ;;  %v471_v31 = vpop.f32.mrb[9].mxu0 }
 0x129   :  { %v1045_v32 = vmax.f32 %v1044_v24, %v742_v30  ;;  %v1252_v33 = vmax.f32 %v1251_v26, %v471_v31  ;;  %v744_v34 = vpop.f32.mrb[9].mxu1  ;;  %v473_v35 = vpop.f32.mrb[10].mxu0 }
 0x12a   :  { %v1066_v36 = vmax.f32 %v1065_v27, %v744_v34  ;;  %v1232_v37 = vmax.f32 %v1231_v29, %v473_v35  ;;  %v746_v38 = vpop.f32.mrb[10].mxu1  ;;  %v475_v39 = vpop.f32.mrb[11].mxu0 }
 0x12b   :  { %v1046_v40 = vmax.f32 %v1045_v32, %v746_v38  ;;  %v1253_v41 = vmax.f32 %v1252_v33, %v475_v39  ;;  %v748_v42 = vpop.f32.mrb[11].mxu1 }
 0x12c   :  { %v1067_v43 = vmax.f32 %v1066_v36, %v748_v42 }
 0x12f   :  { %v479_v44 = vpop.f32.mrb[12].mxu0 }
 0x130   :  { %v1233_v45 = vmax.f32 %v1232_v37, %v479_v44  ;;  %v752_v46 = vpop.f32.mrb[12].mxu1  ;;  %v481_v47 = vpop.f32.mrb[13].mxu0 }
 0x131   :  { %v1047_v48 = vmax.f32 %v1046_v40, %v752_v46  ;;  %v1254_v49 = vmax.f32 %v1253_v41, %v481_v47  ;;  %v754_v50 = vpop.f32.mrb[13].mxu1  ;;  %v483_v51 = vpop.f32.mrb[14].mxu0 }
 0x132   :  { %v1068_v52 = vmax.f32 %v1067_v43, %v754_v50  ;;  %v1234_v53 = vmax.f32 %v1233_v45, %v483_v51  ;;  %v756_v54 = vpop.f32.mrb[14].mxu1  ;;  %v485_v55 = vpop.f32.mrb[15].mxu0 }
 0x133   :  { %v1048_v56 = vmax.f32 %v1047_v48, %v756_v54  ;;  %v1255_v57 = vmax.f32 %v1254_v49, %v485_v55  ;;  %v758_v58 = vpop.f32.mrb[15].mxu1 }
 0x134   :  { %v1069_v59 = vmax.f32 %v1068_v52, %v758_v58 }
 0x137   :  { %v489_v60 = vpop.f32.mrb[16].mxu0 }
 0x138   :  { %v1235_v61 = vmax.f32 %v1234_v53, %v489_v60  ;;  %v762_v62 = vpop.f32.mrb[16].mxu1  ;;  %v491_v63 = vpop.f32.mrb[17].mxu0 }
 0x139   :  { %v1049_v0 = vmax.f32 %v1048_v56, %v762_v62  ;;  %v1256_v1 = vmax.f32 %v1255_v57, %v491_v63  ;;  %v764_v2 = vpop.f32.mrb[17].mxu1  ;;  %v493_v3 = vpop.f32.mrb[18].mxu0 }
 0x13a   :  { %v1070_v4 = vmax.f32 %v1069_v59, %v764_v2  ;;  %v1236_v5 = vmax.f32 %v1235_v61, %v493_v3  ;;  %v766_v6 = vpop.f32.mrb[18].mxu1  ;;  %v495_v7 = vpop.f32.mrb[19].mxu0 }
 0x13b   :  { %v1050_v8 = vmax.f32 %v1049_v0, %v766_v6  ;;  %v1257_v9 = vmax.f32 %v1256_v1, %v495_v7  ;;  %v768_v10 = vpop.f32.mrb[19].mxu1 }
 0x13c   :  { %v1071_v11 = vmax.f32 %v1070_v4, %v768_v10 }
 0x13f   :  { %v499_v12 = vpop.f32.mrb[20].mxu0 }
 0x140   :  { %v1237_v13 = vmax.f32 %v1236_v5, %v499_v12  ;;  %v772_v14 = vpop.f32.mrb[20].mxu1  ;;  %v501_v15 = vpop.f32.mrb[21].mxu0 }
 0x141   :  { %v1051_v16 = vmax.f32 %v1050_v8, %v772_v14  ;;  %v1258_v17 = vmax.f32 %v1257_v9, %v501_v15  ;;  %v774_v18 = vpop.f32.mrb[21].mxu1  ;;  %v503_v19 = vpop.f32.mrb[22].mxu0 }
 0x142   :  { %v1072_v20 = vmax.f32 %v1071_v11, %v774_v18  ;;  %v1238_v21 = vmax.f32 %v1237_v13, %v503_v19  ;;  %v776_v22 = vpop.f32.mrb[22].mxu1  ;;  %v505_v23 = vpop.f32.mrb[23].mxu0 }
 0x143   :  { %v1052_v24 = vmax.f32 %v1051_v16, %v776_v22  ;;  %v1259_v25 = vmax.f32 %v1258_v17, %v505_v23  ;;  %v778_v26 = vpop.f32.mrb[23].mxu1 }
 0x144   :  { %v1073_v27 = vmax.f32 %v1072_v20, %v778_v26 }
 0x147   :  { %v509_v28 = vpop.f32.mrb[24].mxu0 }
 0x148   :  { %v1239_v29 = vmax.f32 %v1238_v21, %v509_v28  ;;  %v782_v30 = vpop.f32.mrb[24].mxu1  ;;  %v511_v31 = vpop.f32.mrb[25].mxu0 }
 0x149   :  { %v1053_v32 = vmax.f32 %v1052_v24, %v782_v30  ;;  %v1260_v33 = vmax.f32 %v1259_v25, %v511_v31  ;;  %v784_v34 = vpop.f32.mrb[25].mxu1  ;;  %v513_v35 = vpop.f32.mrb[26].mxu0 }
 0x14a   :  { %v1074_v36 = vmax.f32 %v1073_v27, %v784_v34  ;;  %v1240_v37 = vmax.f32 %v1239_v29, %v513_v35  ;;  %v786_v38 = vpop.f32.mrb[26].mxu1  ;;  %v515_v39 = vpop.f32.mrb[27].mxu0 }
 0x14b   :  { %v1054_v40 = vmax.f32 %v1053_v32, %v786_v38  ;;  %v1261_v41 = vmax.f32 %v1260_v33, %v515_v39  ;;  %v788_v42 = vpop.f32.mrb[27].mxu1 }
 0x14c   :  { %v1075_v43 = vmax.f32 %v1074_v36, %v788_v42 }
 0x14f   :  { %v519_v44 = vpop.f32.mrb[28].mxu0 }
 0x150   :  { %v1241_v45 = vmax.f32 %v1240_v37, %v519_v44  ;;  %v792_v46 = vpop.f32.mrb[28].mxu1  ;;  %v521_v47 = vpop.f32.mrb[29].mxu0 }
 0x151   :  { %v1055_v48 = vmax.f32 %v1054_v40, %v792_v46  ;;  %v1262_v49 = vmax.f32 %v1261_v41, %v521_v47  ;;  %v794_v50 = vpop.f32.mrb[29].mxu1  ;;  %v523_v51 = vpop.f32.mrb[30].mxu0 }
 0x152   :  { %v1076_v52 = vmax.f32 %v1075_v43, %v794_v50  ;;  %v2234_v53 = vmax.f32 %v1241_v45, %v523_v51  ;;  %v796_v54 = vpop.f32.mrb[30].mxu1  ;;  %v525_v55 = vpop.f32.mrb[31].mxu0 }
 0x153   :  { %v1056_v56 = vmax.f32 %v1055_v48, %v796_v54  ;;  %v2236_v57 = vmax.f32 %v1262_v49, %v525_v55  ;;  %v798_v58 = vpop.f32.mrb[31].mxu1 }
 0x154   :  { %v1077_v59 = vmax.f32 %v1076_v52, %v798_v58 }
 0x155   :  { %v1057_v60 = vrot.slane %v1056_v56, 4 }
 0x156   :  { %v1078_v61 = vrot.slane %v1077_v59, 4 }
 0x157   :  { %v1058_v62 = vmax.f32 %v1056_v56, %v1057_v60  ;;  %v529_v63 = vpop.f32.mrb[32].mxu0 }
 0x158   :  { %v1079_v0 = vmax.f32 %v1077_v59, %v1078_v61  ;;  %v802_v1 = vpop.f32.mrb[32].mxu1  ;;  %v531_v2 = vpop.f32.mrb[33].mxu0 }
 0x159   :  { %v1059_v3 = vrot.slane %v1058_v62, 2  ;;  %v804_v4 = vpop.f32.mrb[33].mxu1  ;;  %v533_v5 = vpop.f32.mrb[34].mxu0 }
 0x15a   :  { %v1080_v6 = vrot.slane %v1079_v0, 2  ;;  %v806_v7 = vpop.f32.mrb[34].mxu1  ;;  %v1270_v8 = vmax.f32 %v529_v63, %v533_v5  ;;  %v535_v9 = vpop.f32.mrb[35].mxu0 }
 0x15b   :  { %v1060_v10 = vmax.f32 %v1058_v62, %v1059_v3  ;;  %v1105_v11 = vmax.f32 %v802_v1, %v806_v7  ;;  %v808_v12 = vpop.f32.mrb[35].mxu1  ;;  %v1291_v13 = vmax.f32 %v531_v2, %v535_v9 }
 0x15c   :  { %v1081_v14 = vmax.f32 %v1079_v0, %v1080_v6  ;;  %v1126_v15 = vmax.f32 %v804_v4, %v808_v12 }
 0x15d   :  { %v1061_v16 = vrot.slane %v1060_v10, 1 }
 0x15e   :  { %v1082_v17 = vrot.slane %v1081_v14, 1 }
 0x15f   :  { %v2238_v18 = vmax.f32 %v1060_v10, %v1061_v16  ;;  %v539_v19 = vpop.f32.mrb[36].mxu0 }
 0x160   :  { %v2240_v20 = vmax.f32 %v1081_v14, %v1082_v17  ;;  %v812_v21 = vpop.f32.mrb[36].mxu1  ;;  %v1271_v22 = vmax.f32 %v1270_v8, %v539_v19  ;;  %v541_v23 = vpop.f32.mrb[37].mxu0 }
 0x161   :  { %v1106_v24 = vmax.f32 %v1105_v11, %v812_v21  ;;  %v814_v25 = vpop.f32.mrb[37].mxu1  ;;  %v1292_v26 = vmax.f32 %v1291_v13, %v541_v23  ;;  %v543_v27 = vpop.f32.mrb[38].mxu0 }
 0x162   :  { %v1174_v28 = vcombine.low %v2238_v18, %v2240_v20  ;;  %v1127_v29 = vmax.f32 %v1126_v15, %v814_v25  ;;  %v816_v30 = vpop.f32.mrb[38].mxu1  ;;  %v1272_v31 = vmax.f32 %v1271_v22, %v543_v27  ;;  %v545_v32 = vpop.f32.mrb[39].mxu0 }
 0x163   :  { %v1107_v33 = vmax.f32 %v1106_v24, %v816_v30  ;;  %v818_v34 = vpop.f32.mrb[39].mxu1  ;;  %v1293_v35 = vmax.f32 %v1292_v26, %v545_v32 }
 0x164   :  { %v1128_v36 = vmax.f32 %v1127_v29, %v818_v34 }
 0x167   :  { %v549_v37 = vpop.f32.mrb[40].mxu0 }
 0x168   :  { %v1273_v38 = vmax.f32 %v1272_v31, %v549_v37  ;;  %v822_v39 = vpop.f32.mrb[40].mxu1  ;;  %v551_v40 = vpop.f32.mrb[41].mxu0 }
 0x169   :  { %v1108_v41 = vmax.f32 %v1107_v33, %v822_v39  ;;  %v1294_v42 = vmax.f32 %v1293_v35, %v551_v40  ;;  %v824_v43 = vpop.f32.mrb[41].mxu1  ;;  %v553_v44 = vpop.f32.mrb[42].mxu0 }
 0x16a   :  { %v1129_v45 = vmax.f32 %v1128_v36, %v824_v43  ;;  %v1274_v46 = vmax.f32 %v1273_v38, %v553_v44  ;;  %v826_v47 = vpop.f32.mrb[42].mxu1  ;;  %v555_v48 = vpop.f32.mrb[43].mxu0 }
 0x16b   :  { %v1109_v49 = vmax.f32 %v1108_v41, %v826_v47  ;;  %v1295_v50 = vmax.f32 %v1294_v42, %v555_v48  ;;  %v828_v51 = vpop.f32.mrb[43].mxu1 }
 0x16c   :  { %v1130_v52 = vmax.f32 %v1129_v45, %v828_v51 }
 0x16f   :  { %v559_v54 = vpop.f32.mrb[44].mxu0 }
 0x170   :  { %v1275_v55 = vmax.f32 %v1274_v46, %v559_v54  ;;  %v832_v56 = vpop.f32.mrb[44].mxu1  ;;  %v561_v58 = vpop.f32.mrb[45].mxu0 }
 0x171   :  { %v1110_v59 = vmax.f32 %v1109_v49, %v832_v56  ;;  %v1296_v60 = vmax.f32 %v1295_v50, %v561_v58  ;;  %v834_v61 = vpop.f32.mrb[45].mxu1  ;;  %v563_v62 = vpop.f32.mrb[46].mxu0  ;;  %v1243_v50 = vrot.slane %v2234_v53, 4  ;;  %v1264_v56 = vrot.slane %v2236_v57, 4 }
 0x172   :  { %v1131_v63 = vmax.f32 %v1130_v52, %v834_v61  ;;  %v1276_v0 = vmax.f32 %v1275_v55, %v563_v62  ;;  %v836_v1 = vpop.f32.mrb[46].mxu1  ;;  %v565_v2 = vpop.f32.mrb[47].mxu0 }
 0x173   :  { %v1111_v3 = vmax.f32 %v1110_v59, %v836_v1  ;;  %v1297_v4 = vmax.f32 %v1296_v60, %v565_v2  ;;  %v838_v5 = vpop.f32.mrb[47].mxu1  ;;  %v1244_v62 = vmax.f32 %v2234_v53, %v1243_v50 }
 0x174   :  { %v1132_v6 = vmax.f32 %v1131_v63, %v838_v5  ;;  %v1265_v63 = vmax.f32 %v2236_v57, %v1264_v56 }
 0x177   :  { %v569_v7 = vpop.f32.mrb[48].mxu0 }
 0x178   :  { %v1277_v8 = vmax.f32 %v1276_v0, %v569_v7  ;;  %v842_v9 = vpop.f32.mrb[48].mxu1  ;;  %v571_v10 = vpop.f32.mrb[49].mxu0 }
 0x179   :  { %v1112_v11 = vmax.f32 %v1111_v3, %v842_v9  ;;  %v1298_v12 = vmax.f32 %v1297_v4, %v571_v10  ;;  %v844_v13 = vpop.f32.mrb[49].mxu1  ;;  %v573_v14 = vpop.f32.mrb[50].mxu0 }
 0x17a   :  { %v1133_v15 = vmax.f32 %v1132_v6, %v844_v13  ;;  %v1278_v16 = vmax.f32 %v1277_v8, %v573_v14  ;;  %v846_v17 = vpop.f32.mrb[50].mxu1  ;;  %v575_v19 = vpop.f32.mrb[51].mxu0  ;;  %v1245_v8 = vrot.slane %v1244_v62, 2  ;;  %v1266_v13 = vrot.slane %v1265_v63, 2 }
 0x17b   :  { %v1113_v21 = vmax.f32 %v1112_v11, %v846_v17  ;;  %v1299_v22 = vmax.f32 %v1298_v12, %v575_v19  ;;  %v848_v23 = vpop.f32.mrb[51].mxu1 }
 0x17c   :  { %v1134_v24 = vmax.f32 %v1133_v15, %v848_v23 }
 0x17f   :  { %v579_v25 = vpop.f32.mrb[52].mxu0 }
 0x180   :  { %v1279_v26 = vmax.f32 %v1278_v16, %v579_v25  ;;  %v852_v27 = vpop.f32.mrb[52].mxu1  ;;  %v581_v29 = vpop.f32.mrb[53].mxu0 }
 0x181   :  { %v1114_v30 = vmax.f32 %v1113_v21, %v852_v27  ;;  %v1300_v31 = vmax.f32 %v1299_v22, %v581_v29  ;;  %v854_v32 = vpop.f32.mrb[53].mxu1  ;;  %v583_v33 = vpop.f32.mrb[54].mxu0  ;;  %v1246_v21 = vmax.f32 %v1244_v62, %v1245_v8 }
 0x182   :  { %v1135_v34 = vmax.f32 %v1134_v24, %v854_v32  ;;  %v1280_v35 = vmax.f32 %v1279_v26, %v583_v33  ;;  %v856_v36 = vpop.f32.mrb[54].mxu1  ;;  %v585_v37 = vpop.f32.mrb[55].mxu0  ;;  %v1267_v24 = vmax.f32 %v1265_v63, %v1266_v13 }
 0x183   :  { %v1115_v38 = vmax.f32 %v1114_v30, %v856_v36  ;;  %v1301_v39 = vmax.f32 %v1300_v31, %v585_v37  ;;  %v858_v40 = vpop.f32.mrb[55].mxu1  ;;  %v1247_v37 = vrot.slane %v1246_v21, 1 }
 0x184   :  { %v1136_v41 = vmax.f32 %v1135_v34, %v858_v40 }
 0x187   :  { %v589_v42 = vpop.f32.mrb[56].mxu0 }
 0x188   :  { %v1281_v43 = vmax.f32 %v1280_v35, %v589_v42  ;;  %v862_v44 = vpop.f32.mrb[56].mxu1  ;;  %v591_v45 = vpop.f32.mrb[57].mxu0 }
 0x189   :  { %v1116_v46 = vmax.f32 %v1115_v38, %v862_v44  ;;  %v1302_v47 = vmax.f32 %v1301_v39, %v591_v45  ;;  %v864_v48 = vpop.f32.mrb[57].mxu1  ;;  %v593_v49 = vpop.f32.mrb[58].mxu0 }
 0x18a   :  { %v1137_v51 = vmax.f32 %v1136_v41, %v864_v48  ;;  %v1282_v52 = vmax.f32 %v1281_v43, %v593_v49  ;;  %v866_v54 = vpop.f32.mrb[58].mxu1  ;;  %v595_v55 = vpop.f32.mrb[59].mxu0  ;;  %v1268_v43 = vrot.slane %v1267_v24, 1 }
 0x18b   :  { %v1117_v58 = vmax.f32 %v1116_v46, %v866_v54  ;;  %v1303_v59 = vmax.f32 %v1302_v47, %v595_v55  ;;  %v868_v60 = vpop.f32.mrb[59].mxu1  ;;  %v1248_v54 = vmax.f32 %v1246_v21, %v1247_v37 }
 0x18c   :  { %v1138_v61 = vmax.f32 %v1137_v51, %v868_v60 }
 0x18f   :  { %v599_v0 = vpop.f32.mrb[60].mxu0 }
 0x190   :  { %v1283_v1 = vmax.f32 %v1282_v52, %v599_v0  ;;  %v872_v2 = vpop.f32.mrb[60].mxu1  ;;  %v601_v3 = vpop.f32.mrb[61].mxu0 }
 0x191   :  { %v1118_v4 = vmax.f32 %v1117_v58, %v872_v2  ;;  %v1304_v5 = vmax.f32 %v1303_v59, %v601_v3  ;;  %v874_v6 = vpop.f32.mrb[61].mxu1  ;;  %v603_v7 = vpop.f32.mrb[62].mxu0  ;;  %v1269_v59 = vmax.f32 %v1267_v24, %v1268_v43 }
 0x192   :  { %v1139_v9 = vmax.f32 %v1138_v61, %v874_v6  ;;  %v1284_v10 = vmax.f32 %v1283_v1, %v603_v7  ;;  %v876_v11 = vpop.f32.mrb[62].mxu1  ;;  %v605_v12 = vpop.f32.mrb[63].mxu0 }
 0x193   :  { %v1119_v14 = vmax.f32 %v1118_v4, %v876_v11  ;;  %v1305_v15 = vmax.f32 %v1304_v5, %v605_v12  ;;  %v878_v16 = vpop.f32.mrb[63].mxu1 }
 0x194   :  { %v1285_v53 = vrot.slane %v1284_v10, 4  ;;  %v1140_v17 = vmax.f32 %v1139_v9, %v878_v16 }
 0x195   :  { %v1120_v57 = vrot.slane %v1119_v14, 4  ;;  %v1306_v19 = vrot.slane %v1305_v15, 4 }
 0x196   :  { %v1286_v22 = vmax.f32 %v1284_v10, %v1285_v53  ;;  %v1141_v23 = vrot.slane %v1140_v17, 4 }
 0x197   :  { %v1121_v25 = vmax.f32 %v1119_v14, %v1120_v57  ;;  %v1307_v26 = vmax.f32 %v1305_v15, %v1306_v19  ;;  %v609_v27 = vpop.f32.mrb[64].mxu0 }
 0x198   :  { %v1287_v29 = vrot.slane %v1286_v22, 2  ;;  %v1142_v30 = vmax.f32 %v1140_v17, %v1141_v23  ;;  %v1630_v31 = vpop.f32.mrb[64].mxu1  ;;  %v611_v32 = vpop.f32.mrb[65].mxu0 }
 0x199   :  { %v1122_v33 = vrot.slane %v1121_v25, 2  ;;  %v1308_v34 = vrot.slane %v1307_v26, 2  ;;  %v915_v35 = vpop.f32.mrb[65].mxu1  ;;  %v613_v36 = vpop.f32.mrb[66].mxu0 }
 0x19a   :  { %v1288_v38 = vmax.f32 %v1286_v22, %v1287_v29  ;;  %v1143_v39 = vrot.slane %v1142_v30, 2  ;;  %v1631_v40 = vpop.f32.mrb[66].mxu1  ;;  %v1312_v41 = vmax.f32 %v609_v27, %v613_v36  ;;  %v615_v42 = vpop.f32.mrb[67].mxu0 }
 0x19b   :  { %v1123_v44 = vmax.f32 %v1121_v25, %v1122_v33  ;;  %v1309_v45 = vmax.f32 %v1307_v26, %v1308_v34  ;;  %v918_v46 = vpop.f32.mrb[67].mxu1  ;;  %v1333_v47 = vmax.f32 %v611_v32, %v615_v42 }
 0x19c   :  { %v1289_v48 = vrot.slane %v1288_v38, 1  ;;  %v1144_v49 = vmax.f32 %v1142_v30, %v1143_v39  ;;  %v1084_v50 = vmax.f32 %v915_v35, %v918_v46 }
 0x19d   :  { %v1124_v51 = vrot.slane %v1123_v44, 1  ;;  %v1310_v52 = vrot.slane %v1309_v45, 1 }
 0x19e   :  { %v1290_v55 = vmax.f32 %v1288_v38, %v1289_v48  ;;  %v1145_v56 = vrot.slane %v1144_v49, 1  ;;  %v1085_v58 = vmax.f32 %v1084_v50, %v1630_v31 }
 0x19f   :  { %v2248_v60 = vmax.f32 %v1123_v44, %v1124_v51  ;;  %v1311_v61 = vmax.f32 %v1309_v45, %v1310_v52  ;;  %v619_v62 = vpop.f32.mrb[68].mxu0 }
 0x1a0   :  { %v2251_v63 = vsel %vm1357_vm1, %v1290_v55, %v1248_v54  ;;  %v2253_v0 = vmax.f32 %v1144_v49, %v1145_v56  ;;  %v1634_v1 = vpop.f32.mrb[68].mxu1  ;;  %v1086_v2 = vmax.f32 %v1085_v58, %v1631_v40  ;;  %v1313_v3 = vmax.f32 %v1312_v41, %v619_v62  ;;  %v621_v4 = vpop.f32.mrb[69].mxu0 }
 0x1a1   :  { %v2256_v5 = vsel %vm1357_vm1, %v1311_v61, %v1269_v59  ;;  %v931_v6 = vpop.f32.mrb[69].mxu1  ;;  %v1334_v7 = vmax.f32 %v1333_v47, %v621_v4  ;;  %v623_v8 = vpop.f32.mrb[70].mxu0  ;;  %v1725_v62 = vmov 1966171168  }
 0x1a2   :  { %v1197_v9 = vcombine.low %v2248_v60, %v2253_v0  ;;  %v1087_v10 = vmax.f32 %v1086_v2, %v931_v6  ;;  %v1635_v11 = vpop.f32.mrb[70].mxu1  ;;  %v1314_v12 = vmax.f32 %v1313_v3, %v623_v8  ;;  %v625_v13 = vpop.f32.mrb[71].mxu0  ;;  %v1178_v2 = vlaneseq }
 0x1a3   :  { %v934_v14 = vpop.f32.mrb[71].mxu1  ;;  %v1335_v15 = vmax.f32 %v1334_v7, %v625_v13 }
 0x1a4   :  { %v1088_v16 = vmax.f32 %v1087_v10, %v934_v14  ;;  %v1179_v14 = vshrl.u32 %v1178_v2, 7  ;;  %vm2267_vm2 = vcmp.lt.s32.totalorder %v1178_v2, 384 }
 0x1a6   :  { %v1089_v53 = vmax.f32 %v1088_v16, %v1634_v1  ;;  %v1176_v1 = vunpack.c.l.s4 %v1725_v62 }
 0x1a7   :  { %v629_v17 = vpop.f32.mrb[72].mxu0 }
 0x1a8   :  { %v1315_v57 = vmax.f32 %v1314_v12, %v629_v17  ;;  %v1638_v19 = vpop.f32.mrb[72].mxu1  ;;  %v631_v21 = vpop.f32.mrb[73].mxu0  ;;  %v1090_v22 = vmax.f32 %v1089_v53, %v1635_v11  ;;  %v1177_v13 = vunpack.c.0.s8 %v1176_v1 }
 0x1a9   :  { %v1336_v23 = vmax.f32 %v1335_v15, %v631_v21  ;;  %v947_v24 = vpop.f32.mrb[73].mxu1  ;;  %v633_v25 = vpop.f32.mrb[74].mxu0 }
 0x1aa   :  { %v1091_v26 = vmax.f32 %v1090_v22, %v947_v24  ;;  %v1316_v27 = vmax.f32 %v1315_v57, %v633_v25  ;;  %v1639_v29 = vpop.f32.mrb[74].mxu1  ;;  %v635_v30 = vpop.f32.mrb[75].mxu0 }
 0x1ab   :  { %v1337_v31 = vmax.f32 %v1336_v23, %v635_v30  ;;  %v950_v32 = vpop.f32.mrb[75].mxu1 }
 0x1ac   :  { %v1092_v33 = vmax.f32 %v1091_v26, %v950_v32  ;;  %v2260_v26 = vsub.s32 %v1177_v13, %v1179_v14 }
 0x1ae   :  { %v1093_v34 = vmax.f32 %v1092_v33, %v1638_v19 }
 0x1af   :  { %v639_v35 = vpop.f32.mrb[76].mxu0 }
 0x1b0   :  { %v1317_v36 = vmax.f32 %v1316_v27, %v639_v35  ;;  %v1642_v37 = vpop.f32.mrb[76].mxu1  ;;  %v641_v38 = vpop.f32.mrb[77].mxu0  ;;  %v1094_v39 = vmax.f32 %v1093_v34, %v1639_v29 }
 0x1b1   :  { %v1338_v40 = vmax.f32 %v1337_v31, %v641_v38  ;;  %v963_v41 = vpop.f32.mrb[77].mxu1  ;;  %v643_v42 = vpop.f32.mrb[78].mxu0 }
 0x1b2   :  { %v1095_v43 = vmax.f32 %v1094_v39, %v963_v41  ;;  %v1318_v44 = vmax.f32 %v1317_v36, %v643_v42  ;;  %v1643_v45 = vpop.f32.mrb[78].mxu1  ;;  %v645_v46 = vpop.f32.mrb[79].mxu0 }
 0x1b3   :  { %v1339_v47 = vmax.f32 %v1338_v40, %v645_v46  ;;  %v966_v48 = vpop.f32.mrb[79].mxu1 }
 0x1b4   :  { %v1096_v49 = vmax.f32 %v1095_v43, %v966_v48 }
 0x1b6   :  { %v1097_v50 = vmax.f32 %v1096_v49, %v1642_v37  ;;  %v1181_v37 = vrot.slane %v1174_v28, %v2260_v26 }
 0x1b7   :  { %v649_v51 = vpop.f32.mrb[80].mxu0 }
 0x1b8   :  { %v1098_v52 = vmax.f32 %v1097_v50, %v1643_v45  ;;  %v1319_v54 = vmax.f32 %v1318_v44, %v649_v51  ;;  %v1646_v55 = vpop.f32.mrb[80].mxu1  ;;  %v651_v56 = vpop.f32.mrb[81].mxu0 }
 0x1b9   :  { %v1340_v58 = vmax.f32 %v1339_v47, %v651_v56  ;;  %v979_v59 = vpop.f32.mrb[81].mxu1  ;;  %v653_v61 = vpop.f32.mrb[82].mxu0 }
 0x1ba   :  { %v1099_v3 = vrot.slane %v1098_v52, 4  ;;  %v1320_v4 = vmax.f32 %v1319_v54, %v653_v61  ;;  %v1647_v6 = vpop.f32.mrb[82].mxu1  ;;  %v655_v7 = vpop.f32.mrb[83].mxu0 }
 0x1bb   :  { %v1341_v8 = vmax.f32 %v1340_v58, %v655_v7  ;;  %v982_v10 = vpop.f32.mrb[83].mxu1 }
 0x1bc   :  { %v1100_v11 = vmax.f32 %v1098_v52, %v1099_v3  ;;  %v1147_v12 = vmax.f32 %v979_v59, %v982_v10 }
 0x1be   :  { %v1101_v15 = vrot.slane %v1100_v11, 2  ;;  %v1148_v16 = vmax.f32 %v1147_v12, %v1646_v55 }
 0x1bf   :  { %v659_v53 = vpop.f32.mrb[84].mxu0 }
 0x1c0   :  { %v1102_v17 = vmax.f32 %v1100_v11, %v1101_v15  ;;  %v1321_v57 = vmax.f32 %v1320_v4, %v659_v53  ;;  %v1650_v19 = vpop.f32.mrb[84].mxu1  ;;  %v661_v21 = vpop.f32.mrb[85].mxu0  ;;  %v1149_v22 = vmax.f32 %v1148_v16, %v1647_v6 }
 0x1c1   :  { %v1342_v23 = vmax.f32 %v1341_v8, %v661_v21  ;;  %v995_v24 = vpop.f32.mrb[85].mxu1  ;;  %v663_v25 = vpop.f32.mrb[86].mxu0 }
 0x1c2   :  { %v1103_v27 = vrot.slane %v1102_v17, 1  ;;  %v1150_v29 = vmax.f32 %v1149_v22, %v995_v24  ;;  %v1322_v30 = vmax.f32 %v1321_v57, %v663_v25  ;;  %v1651_v31 = vpop.f32.mrb[86].mxu1  ;;  %v665_v32 = vpop.f32.mrb[87].mxu0 }
 0x1c3   :  { %v1343_v33 = vmax.f32 %v1342_v23, %v665_v32  ;;  %v998_v34 = vpop.f32.mrb[87].mxu1 }
 0x1c4   :  { %v1104_v35 = vmax.f32 %v1102_v17, %v1103_v27  ;;  %v1151_v36 = vmax.f32 %v1150_v29, %v998_v34 }
 0x1c6   :  { %v1188_v38 = vrot.slane %v1104_v35, %v2260_v26  ;;  %v1152_v39 = vmax.f32 %v1151_v36, %v1650_v19 }
 0x1c7   :  { %v669_v40 = vpop.f32.mrb[88].mxu0 }
 0x1c8   :  { %v1189_v41 = vcombine.low %v1181_v37, %v1188_v38  ;;  %v1323_v42 = vmax.f32 %v1322_v30, %v669_v40  ;;  %v1654_v43 = vpop.f32.mrb[88].mxu1  ;;  %v671_v44 = vpop.f32.mrb[89].mxu0  ;;  %v1153_v45 = vmax.f32 %v1152_v39, %v1651_v31  ;;  %v1204_v38 = vrot.slane %v1197_v9, %v2260_v26 }
 0x1c9   :  { %v1344_v47 = vmax.f32 %v1343_v33, %v671_v44  ;;  %v1011_v48 = vpop.f32.mrb[89].mxu1  ;;  %v673_v49 = vpop.f32.mrb[90].mxu0 }
 0x1ca   :  { %v1196_v50 = vrot.slane %v1189_v41, %v2260_v26  ;;  %v1154_v18 = vmax.f32 %v1153_v45, %v1011_v48  ;;  %v1324_v20 = vmax.f32 %v1323_v42, %v673_v49  ;;  %v1655_v28 = vpop.f32.mrb[90].mxu1  ;;  %v675_v51 = vpop.f32.mrb[91].mxu0 }
 0x1cb   :  { %v1345_v52 = vmax.f32 %v1344_v47, %v675_v51  ;;  %v1014_v54 = vpop.f32.mrb[91].mxu1 }
 0x1cc   :  { %1226 = vst.msk [vmem:[%s2298_s3] sm:$0x7] %vm2267_vm2, %v1196_v50  ;;  %v1155_v55 = vmax.f32 %v1154_v18, %v1014_v54 }
 0x1ce   :  { %v1156_v56 = vmax.f32 %v1155_v55, %v1654_v43 }
 0x1cf   :  { %v679_v58 = vpop.f32.mrb[92].mxu0 }
 0x1d0   :  { %v1325_v59 = vmax.f32 %v1324_v20, %v679_v58  ;;  %v1658_v61 = vpop.f32.mrb[92].mxu1  ;;  %v681_v62 = vpop.f32.mrb[93].mxu0  ;;  %v1157_v1 = vmax.f32 %v1156_v56, %v1655_v28 }
 0x1d1   :  { %v1346_v2 = vmax.f32 %v1345_v52, %v681_v62  ;;  %v1027_v3 = vpop.f32.mrb[93].mxu1  ;;  %v683_v4 = vpop.f32.mrb[94].mxu0 }
 0x1d2   :  { %v1158_v6 = vmax.f32 %v1157_v1, %v1027_v3  ;;  %v1326_v7 = vmax.f32 %v1325_v59, %v683_v4  ;;  %v1659_v8 = vpop.f32.mrb[94].mxu1  ;;  %v685_v10 = vpop.f32.mrb[95].mxu0 }
 0x1d3   :  { %v1347_v11 = vmax.f32 %v1346_v2, %v685_v10  ;;  %v1030_v12 = vpop.f32.mrb[95].mxu1 }
 0x1d4   :  { %v1327_v13 = vrot.slane %v1326_v7, 4  ;;  %v1159_v14 = vmax.f32 %v1158_v6, %v1030_v12 }
 0x1d5   :  { %v1348_v15 = vrot.slane %v1347_v11, 4 }
 0x1d6   :  { %v1328_v16 = vmax.f32 %v1326_v7, %v1327_v13  ;;  %v1160_v53 = vmax.f32 %v1159_v14, %v1658_v61 }
 0x1d7   :  { %v1349_v17 = vmax.f32 %v1347_v11, %v1348_v15 }
 0x1d8   :  { %v1329_v57 = vrot.slane %v1328_v16, 2  ;;  %v1161_v19 = vmax.f32 %v1160_v53, %v1659_v8 }
 0x1d9   :  { %v1350_v21 = vrot.slane %v1349_v17, 2 }
 0x1da   :  { %v1330_v22 = vmax.f32 %v1328_v16, %v1329_v57  ;;  %v1162_v23 = vrot.slane %v1161_v19, 4 }
 0x1db   :  { %v1351_v24 = vmax.f32 %v1349_v17, %v1350_v21 }
 0x1dc   :  { %v1331_v25 = vrot.slane %v1330_v22, 1  ;;  %v1163_v27 = vmax.f32 %v1161_v19, %v1162_v23 }
 0x1dd   :  { %v1352_v29 = vrot.slane %v1351_v24, 1 }
 0x1de   :  { %v1332_v30 = vmax.f32 %v1330_v22, %v1331_v25  ;;  %v1164_v31 = vrot.slane %v1163_v27, 2 }
 0x1df   :  { %v1353_v32 = vmax.f32 %v1351_v24, %v1352_v29 }
 0x1e0   :  { %v1360_v33 = vsel %vm1359_vm3, %v1332_v30, %v2251_v63  ;;  %v1165_v34 = vmax.f32 %v1163_v27, %v1164_v31 }
 0x1e1   :  { %1362 = vst [vmem:[%s2299_s2] sm:$0x7] %v1360_v33  ;;  %v1367_v35 = vsel %vm1359_vm3, %v1353_v32, %v2256_v5 }
 0x1e2   :  { %1475 = vst [vmem:[%s2299_s2 + $0x4] sm:$0x7] %v1367_v35  ;;  %v1166_v36 = vrot.slane %v1165_v34, 1 }
 0x1e4   :  { %v1167_v37 = vmax.f32 %v1165_v34, %v1166_v36 }
 0x1e6   :  { %v1211_v63 = vrot.slane %v1167_v37, %v2260_v26 }
 0x1e8   :  { %v1212_v39 = vcombine.low %v1204_v38, %v1211_v63 }
 0x1ea   :  { %v1219_v40 = vrot.slane %v1212_v39, %v2260_v26 }
 0x1ec   :  { %1227 = vst.msk [vmem:[%s2298_s3 + $0x3] sm:$0x7] %vm2267_vm2, %v1219_v40 }

</bundles_post_ra>
